<compile_context>
chip_gen: v6e
topology: v6e:2x2x1
jax: 0.10.0
libtpu: 0.0.40
codegen_flags: <defaults>
</compile_context>

<pallas_src>
import functools

import jax
import jax.numpy as jnp
from jax.experimental import pallas as pl
from jax.experimental.pallas import tpu as pltpu


def _round_up(x, m):
    return (x + m - 1) // m * m


def _decoder_kernel_cond(n_layers, z_ref, c_ref, *refs):
    """Fused conditional-decoder MLP kernel.

    refs = (w0_z, w0_c, b0, w1, b1, ..., w_{L-1}, b_{L-1}, out_ref).
    Weights/biases are whole-array VMEM tiles (constant index_map, resident
    across grid steps); z/c/out are batch tiles.
    """
    out_ref = refs[-1]
    w0_z = refs[0][...]
    w0_c = refs[1][...]
    b0 = refs[2][...]  # (1, out0)

    # Layer 0 with the concat folded in: concat([z,c]) @ W0 == z@W0_z + c@W0_c
    h = (
        jnp.dot(z_ref[...], w0_z, preferred_element_type=jnp.float32)
        + jnp.dot(c_ref[...], w0_c, preferred_element_type=jnp.float32)
        + b0
    )
    if n_layers > 1:
        h = jnp.maximum(h, 0.0)

    for i in range(1, n_layers):
        w = refs[3 + 2 * (i - 1)][...]
        b = refs[3 + 2 * (i - 1) + 1][...]
        h = jnp.dot(h, w, preferred_element_type=jnp.float32) + b
        if i + 1 < n_layers:
            h = jnp.maximum(h, 0.0)  # ReLU between layers, not after last

    out_ref[...] = h.astype(out_ref.dtype)


def _decoder_kernel_uncond(n_layers, z_ref, *refs):
    """Fused unconditional-decoder MLP kernel.

    refs = (w0, b0, w1, b1, ..., out_ref)
    """
    out_ref = refs[-1]
    h = z_ref[...].astype(jnp.float32)
    for i in range(n_layers):
        w = refs[2 * i][...]
        b = refs[2 * i + 1][...]
        h = jnp.dot(h, w, preferred_element_type=jnp.float32) + b
        if i + 1 < n_layers:
            h = jnp.maximum(h, 0.0)
    out_ref[...] = h.astype(out_ref.dtype)


def decoder_forward(z, c, weights, biases, *, conditional=True, block_b=512):
    """Decoder forward pass via a single fused, batch-gridded Pallas kernel.

    z: [B, latent_size] float32
    c: [B, condition_size] float32 (ignored if not conditional)
    weights: list of [in_i, out_i] float32  (transposed vs. torch Linear)
    biases:  list of [out_i] float32
    """
    n_layers = len(weights)
    B = z.shape[0]
    latent = z.shape[1]
    out_dim = weights[-1].shape[1]

    # Batch tile: multiple of 8 (sublane), capped at block_b rows.
    tb = min(block_b, _round_up(max(B, 1), 8))
    bp = _round_up(B, tb)
    pad = bp - B
    grid = (bp // tb,)

    z_p = jnp.pad(z, ((0, pad), (0, 0))) if pad else z

    # Biases as (1, out) so they are proper 2-D VMEM tiles.
    biases_2d = [b.reshape(1, -1) for b in biases]

    if conditional:
        c_p = jnp.pad(c, ((0, pad), (0, 0))) if pad else c
        cond_dim = c.shape[1]
        # Fold the concat into layer 0 by splitting W0 along its input dim.
        w0 = weights[0]
        w0_z = w0[:latent, :]
        w0_c = w0[latent:, :]
        params = [w0_z, w0_c, biases_2d[0]]
        for w, b in zip(weights[1:], biases_2d[1:]):
            params.append(w)
            params.append(b)
        kernel = functools.partial(_decoder_kernel_cond, n_layers)
        data_inputs = (z_p, c_p)
        data_specs = [
            pl.BlockSpec((tb, latent), lambda i: (i, 0)),
            pl.BlockSpec((tb, cond_dim), lambda i: (i, 0)),
        ]
    else:
        params = []
        for w, b in zip(weights, biases_2d):
            params.append(w)
            params.append(b)
        kernel = functools.partial(_decoder_kernel_uncond, n_layers)
        data_inputs = (z_p,)
        data_specs = [pl.BlockSpec((tb, latent), lambda i: (i, 0))]

    # Parameters: full-extent blocks with a constant index_map -> VMEM-resident
    # across all batch-grid iterations (no re-DMA per step).
    param_specs = [pl.BlockSpec(p.shape, lambda i: (0, 0)) for p in params]

    out = pl.pallas_call(
        kernel,
        out_shape=jax.ShapeDtypeStruct((bp, out_dim), jnp.float32),
        grid=grid,
        in_specs=data_specs + param_specs,
        out_specs=pl.BlockSpec((tb, out_dim), lambda i: (i, 0)),
        compiler_params=pltpu.CompilerParams(
            # Batch axis is embarrassingly parallel -> shard across TCs (v7x).
            dimension_semantics=("parallel",),
            # Explicit VMEM budget with headroom; sized for v7x's 64 MiB chip
            # (we use only a few hundred KiB at these feature widths).
            vmem_limit_bytes=32 * 1024 * 1024,
        ),
    )(*data_inputs, *params)

    return out[:B] if pad else out


def _reference_forward(z, c, weights, biases, *, conditional=True):
    x = jnp.concatenate([z, c], axis=-1) if conditional else z
    n = len(weights)
    for i, (w, b) in enumerate(zip(weights, biases)):
        x = x @ w + b
        if i + 1 < n:
            x = jnp.maximum(x, 0.0)
    return x


if __name__ == "__main__":
    # Module config (small, consistent with the Decoder __init__):
    latent_size = 8
    condition_size = 8
    layer_sizes = [32, 32, 16]
    conditional = True
    input_size = latent_size + condition_size if conditional else latent_size

    batch = 2

    key = jax.random.PRNGKey(0)
    k_z, k_c, key = jax.random.split(key, 3)
    z = jax.random.normal(k_z, (batch, latent_size), dtype=jnp.float32)
    c = jax.random.normal(k_c, (batch, condition_size), dtype=jnp.float32)

    # Deterministic synthetic parameters (shapes match nn.Linear layers,
    # stored as [in, out] i.e. transposed vs. PyTorch's [out, in]).
    weights = []
    biases = []
    in_sizes = [input_size] + layer_sizes[:-1]
    for in_s, out_s in zip(in_sizes, layer_sizes):
        kw, kb, key = jax.random.split(key, 3)
        weights.append(0.1 * jax.random.normal(kw, (in_s, out_s), dtype=jnp.float32))
        biases.append(0.1 * jax.random.normal(kb, (out_s,), dtype=jnp.float32))

    out = decoder_forward(z, c, weights, biases, conditional=conditional)
    out = jax.block_until_ready(out)

    ref = _reference_forward(z, c, weights, biases, conditional=conditional)
    assert out.shape == (batch, layer_sizes[-1])
    assert jnp.allclose(out, ref, atol=1e-5, rtol=1e-5), "mismatch vs reference"

    print("KERNEL_OK")
</pallas_src>

<mosaic_0001>
module attributes {stable_mosaic.version = 11 : i64} {
  func.func @_decoder_kernel_cond(%arg0: i32, %arg1: memref<8x8xf32, #tpu.memory_space<vmem>>, %arg2: memref<8x8xf32, #tpu.memory_space<vmem>>, %arg3: memref<8x32xf32, #tpu.memory_space<vmem>>, %arg4: memref<8x32xf32, #tpu.memory_space<vmem>>, %arg5: memref<1x32xf32, #tpu.memory_space<vmem>>, %arg6: memref<32x32xf32, #tpu.memory_space<vmem>>, %arg7: memref<1x32xf32, #tpu.memory_space<vmem>>, %arg8: memref<32x16xf32, #tpu.memory_space<vmem>>, %arg9: memref<1x16xf32, #tpu.memory_space<vmem>>, %arg10: memref<8x16xf32, #tpu.memory_space<vmem>>) attributes {dimension_semantics = [#tpu.dimension_semantics<parallel>], iteration_bounds = array<i64: 1>, scalar_prefetch = 0 : i64, scratch_operands = 0 : i64, tpu.core_type = #tpu.core_type<tc>, window_params = [{transform_indices = @transform_0, window_bounds = array<i64: 8, 8>}, {transform_indices = @transform_1, window_bounds = array<i64: 8, 8>}, {pipeline_mode = #tpu.pipeline_mode<synchronous>, transform_indices = @transform_2, window_bounds = array<i64: 8, 32>}, {pipeline_mode = #tpu.pipeline_mode<synchronous>, transform_indices = @transform_3, window_bounds = array<i64: 8, 32>}, {pipeline_mode = #tpu.pipeline_mode<synchronous>, transform_indices = @transform_4, window_bounds = array<i64: 1, 32>}, {pipeline_mode = #tpu.pipeline_mode<synchronous>, transform_indices = @transform_5, window_bounds = array<i64: 32, 32>}, {pipeline_mode = #tpu.pipeline_mode<synchronous>, transform_indices = @transform_6, window_bounds = array<i64: 1, 32>}, {pipeline_mode = #tpu.pipeline_mode<synchronous>, transform_indices = @transform_7, window_bounds = array<i64: 32, 16>}, {pipeline_mode = #tpu.pipeline_mode<synchronous>, transform_indices = @transform_8, window_bounds = array<i64: 1, 16>}, {transform_indices = @transform_9, window_bounds = array<i64: 8, 16>}]} {
    %c0 = arith.constant 0 : index
    %c0_0 = arith.constant 0 : index
    %0 = vector.load %arg3[%c0, %c0_0] : memref<8x32xf32, #tpu.memory_space<vmem>>, vector<8x32xf32>
    %c0_1 = arith.constant 0 : index
    %c0_2 = arith.constant 0 : index
    %1 = vector.load %arg4[%c0_1, %c0_2] : memref<8x32xf32, #tpu.memory_space<vmem>>, vector<8x32xf32>
    %c0_3 = arith.constant 0 : index
    %c0_4 = arith.constant 0 : index
    %2 = vector.load %arg5[%c0_3, %c0_4] : memref<1x32xf32, #tpu.memory_space<vmem>>, vector<1x32xf32>
    %c0_5 = arith.constant 0 : index
    %c0_6 = arith.constant 0 : index
    %3 = vector.load %arg1[%c0_5, %c0_6] : memref<8x8xf32, #tpu.memory_space<vmem>>, vector<8x8xf32>
    %cst = arith.constant dense<0.000000e+00> : vector<8x32xf32>
    %4 = tpu.matmul %3, %0, %cst {dimension_numbers = #tpu.dot_dimension_numbers<[1], [0], [0], [1], [0, 0, 1, 1], [], []>} : vector<8x8xf32>, vector<8x32xf32>, vector<8x32xf32> -> vector<8x32xf32>
    %c0_7 = arith.constant 0 : index
    %c0_8 = arith.constant 0 : index
    %5 = vector.load %arg2[%c0_7, %c0_8] : memref<8x8xf32, #tpu.memory_space<vmem>>, vector<8x8xf32>
    %cst_9 = arith.constant dense<0.000000e+00> : vector<8x32xf32>
    %6 = tpu.matmul %5, %1, %cst_9 {dimension_numbers = #tpu.dot_dimension_numbers<[1], [0], [0], [1], [0, 0, 1, 1], [], []>} : vector<8x8xf32>, vector<8x32xf32>, vector<8x32xf32> -> vector<8x32xf32>
    %7 = arith.addf %4, %6 : vector<8x32xf32>
    %8 = vector.broadcast %2 : vector<1x32xf32> to vector<8x32xf32>
    %9 = arith.addf %7, %8 : vector<8x32xf32>
    %cst_10 = arith.constant 0.000000e+00 : f32
    %10 = vector.broadcast %cst_10 : f32 to vector<8x32xf32>
    %11 = arith.maximumf %9, %10 : vector<8x32xf32>
    %c0_11 = arith.constant 0 : index
    %c0_12 = arith.constant 0 : index
    %12 = vector.load %arg6[%c0_11, %c0_12] : memref<32x32xf32, #tpu.memory_space<vmem>>, vector<32x32xf32>
    %c0_13 = arith.constant 0 : index
    %c0_14 = arith.constant 0 : index
    %13 = vector.load %arg7[%c0_13, %c0_14] : memref<1x32xf32, #tpu.memory_space<vmem>>, vector<1x32xf32>
    %cst_15 = arith.constant dense<0.000000e+00> : vector<8x32xf32>
    %14 = tpu.matmul %11, %12, %cst_15 {dimension_numbers = #tpu.dot_dimension_numbers<[1], [0], [0], [1], [0, 0, 1, 1], [], []>} : vector<8x32xf32>, vector<32x32xf32>, vector<8x32xf32> -> vector<8x32xf32>
    %15 = vector.broadcast %13 : vector<1x32xf32> to vector<8x32xf32>
    %16 = arith.addf %14, %15 : vector<8x32xf32>
    %cst_16 = arith.constant 0.000000e+00 : f32
    %17 = vector.broadcast %cst_16 : f32 to vector<8x32xf32>
    %18 = arith.maximumf %16, %17 : vector<8x32xf32>
    %c0_17 = arith.constant 0 : index
    %c0_18 = arith.constant 0 : index
    %19 = vector.load %arg8[%c0_17, %c0_18] : memref<32x16xf32, #tpu.memory_space<vmem>>, vector<32x16xf32>
    %c0_19 = arith.constant 0 : index
    %c0_20 = arith.constant 0 : index
    %20 = vector.load %arg9[%c0_19, %c0_20] : memref<1x16xf32, #tpu.memory_space<vmem>>, vector<1x16xf32>
    %cst_21 = arith.constant dense<0.000000e+00> : vector<8x16xf32>
    %21 = tpu.matmul %18, %19, %cst_21 {dimension_numbers = #tpu.dot_dimension_numbers<[1], [0], [0], [1], [0, 0, 1, 1], [], []>} : vector<8x32xf32>, vector<32x16xf32>, vector<8x16xf32> -> vector<8x16xf32>
    %22 = vector.broadcast %20 : vector<1x16xf32> to vector<8x16xf32>
    %23 = arith.addf %21, %22 : vector<8x16xf32>
    %c0_22 = arith.constant 0 : index
    %c0_23 = arith.constant 0 : index
    %24 = vector.load %arg10[%c0_22, %c0_23] : memref<8x16xf32, #tpu.memory_space<vmem>>, vector<8x16xf32>
    tpu.vector_store %arg10[%c0_22, %c0_23], %23 {strides = array<i32>} : memref<8x16xf32, #tpu.memory_space<vmem>>, vector<8x16xf32>,
    return
  }
  func.func @transform_0(%arg0: i32) -> (i32, i32) {
    %c0_i32 = arith.constant 0 : i32
    %c0_i32_0 = arith.constant 0 : i32
    return %arg0, %c0_i32 : i32, i32
  }
  func.func @transform_1(%arg0: i32) -> (i32, i32) {
    %c0_i32 = arith.constant 0 : i32
    %c0_i32_0 = arith.constant 0 : i32
    return %arg0, %c0_i32 : i32, i32
  }
  func.func @transform_2(%arg0: i32) -> (i32, i32) {
    %c0_i32 = arith.constant 0 : i32
    %c0_i32_0 = arith.constant 0 : i32
    %c0_i32_1 = arith.constant 0 : i32
    return %c0_i32, %c0_i32_0 : i32, i32
  }
  func.func @transform_3(%arg0: i32) -> (i32, i32) {
    %c0_i32 = arith.constant 0 : i32
    %c0_i32_0 = arith.constant 0 : i32
    %c0_i32_1 = arith.constant 0 : i32
    return %c0_i32, %c0_i32_0 : i32, i32
  }
  func.func @transform_4(%arg0: i32) -> (i32, i32) {
    %c0_i32 = arith.constant 0 : i32
    %c0_i32_0 = arith.constant 0 : i32
    %c0_i32_1 = arith.constant 0 : i32
    return %c0_i32, %c0_i32_0 : i32, i32
  }
  func.func @transform_5(%arg0: i32) -> (i32, i32) {
    %c0_i32 = arith.constant 0 : i32
    %c0_i32_0 = arith.constant 0 : i32
    %c0_i32_1 = arith.constant 0 : i32
    return %c0_i32, %c0_i32_0 : i32, i32
  }
  func.func @transform_6(%arg0: i32) -> (i32, i32) {
    %c0_i32 = arith.constant 0 : i32
    %c0_i32_0 = arith.constant 0 : i32
    %c0_i32_1 = arith.constant 0 : i32
    return %c0_i32, %c0_i32_0 : i32, i32
  }
  func.func @transform_7(%arg0: i32) -> (i32, i32) {
    %c0_i32 = arith.constant 0 : i32
    %c0_i32_0 = arith.constant 0 : i32
    %c0_i32_1 = arith.constant 0 : i32
    return %c0_i32, %c0_i32_0 : i32, i32
  }
  func.func @transform_8(%arg0: i32) -> (i32, i32) {
    %c0_i32 = arith.constant 0 : i32
    %c0_i32_0 = arith.constant 0 : i32
    %c0_i32_1 = arith.constant 0 : i32
    return %c0_i32, %c0_i32_0 : i32, i32
  }
  func.func @transform_9(%arg0: i32) -> (i32, i32) {
    %c0_i32 = arith.constant 0 : i32
    %c0_i32_0 = arith.constant 0 : i32
    return %arg0, %c0_i32 : i32, i32
  }
}

</mosaic_0001>

<bundles_post_ra>
// kernel: tpu_custom_call.1
= control target key start
LH: loop header
LB: loop body
LE: loop exit
PB: predicated region body
PF: predicated region fallthrough
CT: control target
= control target key end

     0   :  { %14 = vsyncpa [#allocation3], 0  ;;  %s597_s0 = inlined_call_operand.vmem [shape: f32[8,8], index: 0, kind: input, shape index: {}]   ;;  %s598_s1 = inlined_call_operand.vmem [shape: f32[8,8], index: 1, kind: input, shape index: {}]   ;;  %s599_s2 = inlined_call_operand.vmem [shape: f32[8,32], index: 2, kind: input, shape index: {}]   ;;  %s600_s3 = inlined_call_operand.hbm [shape: f32[8,32], index: 3, kind: input, shape index: {}]   ;;  %s601_s4 = inlined_call_operand.vmem [shape: f32[1,32], index: 4, kind: input, shape index: {}]   ;;  %s602_s5 = inlined_call_operand.vmem [shape: f32[32,32], index: 5, kind: input, shape index: {}]   ;;  %s603_s6 = inlined_call_operand.vmem [shape: f32[1,32], index: 6, kind: input, shape index: {}]   ;;  %s604_s7 = inlined_call_operand.vmem [shape: f32[32,16], index: 7, kind: input, shape index: {}]   ;;  %s605_s8 = inlined_call_operand.vmem [shape: f32[1,16], index: 8, kind: input, shape index: {}]   ;;  %s606_s9 = inlined_call_operand.hbm [shape: f32[8,16], index: 9, kind: output, shape index: {}]  }
   0x1   :  { %15 = vsyncpa [#allocation4], 0  ;;  %s493_s30 = smov [#allocation2]  }
   0x2   :  { %s28_s10 = sshll.u32 %s493_s30, 4  ;;  %s29_s10 = int_to_ptr.vmem [resolvable:$true] %s28_s10 }
   0x3   :  { %s457_s11 = scalar_lea.vmem %s29_s10, 128  ;;  %p462_p1 = scmp.lt.s32.totalorder %s29_s10, %s29_s10 }
   0x4   :  { %p458_p0 = scmp.ne.s32.totalorder %s29_s10, %s457_s11  ;;  %p463_p2 = scmp.lt.s32.totalorder %s457_s11, %s457_s11 }
   0x6   :  { %p464_p3 = por %p463_p2, %p462_p1 }
   0x8   :  { %p465_p4 = pnand %p464_p3, %p458_p0 }
   0xa   :  { %468 = shalt.err (!%p465_p4)
}
   0xb   :  { %31 = dma.hbm_to_vmem [thread:$0]  %s600_s3, 128, %s29_s10, [#allocation3]  }
   0xc   :  { %489 = dma.done.wait [#allocation3], 128  }
   0xd   :  { %490 = vsyncadd [#allocation3], 4294967168  ;;  %v494_v0 = vmov 0.0   ;;  %vm495_vm0 = vmmov 0   ;;  %vm50_vm1 = vcmask 64512   ;;  %v46_v1 = vld [vmem:[#allocation2] sm:$0xff] }
   0xe   :  { %413 = vmatprep.subr.mxu0 %v494_v0  ;;  %418 = vmatprep.subr.mxu1 %v494_v0  ;;  %v45_v2 = vld [vmem:[%s599_s2] sm:$0xff]  ;;  %v208_v5 = vld [vmem:[%s602_s5 + $0x18] sm:$0xff]  ;;  %v207_v6 = vld [vmem:[%s602_s5 + $0x10] sm:$0xff]  ;;  %vm216_vm2 = vcmask 261120   ;;  %s496_s15 = smov [#allocation5]   ;;  %vm375_vm3 = vcmask 130048  }
   0xf   :  { %415 = vmatprep.mubr.msk.f32.mxu0 %vm495_vm0, %v494_v0  ;;  %420 = vmatprep.mubr.msk.f32.mxu1 %vm495_vm0, %v494_v0  ;;  %v49_v3 = vld [vmem:[%s598_s1] sm:$0xff]  ;;  %v206_v7 = vld [vmem:[%s602_s5 + $0x8] sm:$0xff]  ;;  %v294_v9 = vld [vmem:[%s604_s7 + $0x18] sm:$0xff]  ;;  %s383_s16 = sshll.u32 %s496_s15, 4  ;;  %s384_s16 = int_to_ptr.vmem [resolvable:$true] %s383_s16 }
  0x10   :  { %414 = vmatpush3.msra.mxu0 %v46_v1  ;;  %419 = vmatpush3.msra.mxu1 %v45_v2  ;;  %v48_v4 = vld [vmem:[%s597_s0] sm:$0xff]  ;;  %v293_v18 = vld [vmem:[%s604_s7 + $0x10] sm:$0xff]  ;;  %v292_v19 = vld [vmem:[%s604_s7 + $0x8] sm:$0xff]  ;;  %p474_p6 = scmp.lt.s32.totalorder %s384_s16, %s384_s16 }
  0x11   :  { %416 = vmatmul.mubr.msk.f32.vlgmr.msra.gmra.mxu0 %vm50_vm1, %v49_v3  ;;  %421 = vmatmul.mubr.msk.f32.vlgmr.msra.gmra.mxu1 %vm50_vm1, %v48_v4  ;;  %v205_v8 = vld [vmem:[%s602_s5] sm:$0xff] }
  0x12   :  { %423 = vmatprep.subr.mxu0 %v494_v0  ;;  %431 = vmatprep.mubr.msk.f32.mxu0 %vm495_vm0, %v494_v0  ;;  %v394_v11 = vld [vmem:[%s601_s4] ss:$0 sm:$0xff] }
  0x13   :  { %434 = vmatprep.subr.mxu1 %v494_v0  ;;  %442 = vmatprep.mubr.msk.f32.mxu1 %vm495_vm0, %v494_v0  ;;  %v291_v20 = vld [vmem:[%s604_s7] sm:$0xff]  ;;  %s469_s7 = scalar_lea.vmem %s384_s16, 128 }
  0x14   :  { %424 = vmatpush3.msra.mxu0 %v208_v5  ;;  %435 = vmatpush3.msra.mxu1 %v294_v9  ;;  %v395_v21 = vld [vmem:[%s603_s6] ss:$0 sm:$0xff]  ;;  %p470_p5 = scmp.ne.s32.totalorder %s384_s16, %s469_s7  ;;  %p475_p7 = scmp.lt.s32.totalorder %s469_s7, %s469_s7 }
  0x15   :  { %425 = vmatprep.subr.mxu0 %v494_v0  ;;  %436 = vmatprep.subr.mxu1 %v494_v0  ;;  %v397_v26 = vld [vmem:[%s605_s8] ss:$0 sm:$0xff] }
  0x16   :  { %426 = vmatpush3.msra.mxu0 %v207_v6  ;;  %437 = vmatpush3.msra.mxu1 %v293_v18  ;;  %p476_p8 = por %p475_p7, %p474_p6 }
  0x17   :  { %427 = vmatprep.subr.mxu0 %v494_v0  ;;  %438 = vmatprep.subr.mxu1 %v494_v0 }
  0x18   :  { %428 = vmatpush3.msra.mxu0 %v206_v7  ;;  %439 = vmatpush3.msra.mxu1 %v292_v19  ;;  %p477_p9 = pnand %p476_p8, %p470_p5 }
  0x19   :  { %429 = vmatprep.subr.mxu0 %v494_v0  ;;  %440 = vmatprep.subr.mxu1 %v494_v0 }
  0x1a   :  { %430 = vmatpush3.msra.mxu0 %v205_v8  ;;  %441 = vmatpush3.msra.mxu1 %v291_v20 }
  0xd1   :  { %v120_v10 = vpop.f32.mrf.mxu0  ;;  %v193_v12 = vpop.f32.mrf.mxu1 }
  0xd2   :  { %v194_v13 = vadd.f32 %v193_v12, %v120_v10 }
  0xd3   :  { %v417_v14 = vpop.f32.mrf.mxu0  ;;  %v422_v15 = vpop.f32.mrf.mxu1 }
  0xd4   :  { %v203_v16 = vadd.f32 %v394_v11, %v194_v13 }
  0xd6   :  { %v204_v17 = vmax.f32 %v203_v16, 0.0 }
  0xd8   :  { %432 = vmatmul.mubr.msk.f32.vlgmr.msra.gmra.mxu0 %vm216_vm2, %v204_v17 }
 0x198   :  { %v286_v22 = vpop.f32.mrf.mxu0 }
 0x199   :  { %v287_v23 = vadd.f32 %v395_v21, %v286_v22 }
 0x19a   :  { %v433_v24 = vpop.f32.mrf.mxu0 }
 0x19b   :  { %v290_v25 = vmax.f32 %v287_v23, 0.0 }
 0x19d   :  { %443 = vmatmul.mubr.msk.f32.vlgmr.msra.gmra.mxu1 %vm216_vm2, %v290_v25 }
 0x25d   :  { %v371_v27 = vpop.f32.mrf.mxu1 }
 0x25e   :  { %v372_v28 = vadd.f32 %v397_v26, %v371_v27 }
 0x25f   :  { %v444_v29 = vpop.f32.mrf.mxu1 }
 0x260   :  { %376 = vst.msk [vmem:[#allocation5] sm:$0xff] %vm375_vm3, %v372_v28 }
 0x261   :  { %480 = shalt.err (!%p477_p9)
}
 0x262   :  { %386 = dma.vmem_to_hbm [thread:$0]  %s384_s16, 128, %s606_s9, [#allocation4]  }
 0x263   :  { %491 = dma.done.wait [#allocation4], 128  }
 0x264   :  { %492 = vsyncadd [#allocation4], 4294967168 }
 0x265   :  { %390 = vsyncpa [#allocation3], 1 }
 0x266   :  { %391 = vsyncpa [#allocation4], 1 }

</bundles_post_ra>
